<compile_context>
chip_gen: v6e
topology: v6e:2x2x1
jax: 0.10.0
libtpu: 0.0.40
codegen_flags: <defaults>
</compile_context>

<pallas_src>
import jax
import jax.numpy as jnp
from jax.experimental import pallas as pl
from jax.experimental.pallas import tpu as pltpu


_VMEM_LIMIT = 32 * 1024 * 1024  # explicit scoped-VMEM budget, safe on v5e/v6e/v7x


def _partial_sums_kernel(x_ref, sum_ref, sq_ref):
    # Per-tile fp32 partials, reduced over the sublane axis only (lane-wise
    # vectors stay 128-wide); the tiny cross-lane combine happens in the wrapper.
    xf = x_ref[...].astype(jnp.float32)                            # (TR, L)
    sum_ref[...] = jnp.sum(xf, axis=0, keepdims=True)[None]        # (1, 1, L)
    sq_ref[...] = jnp.sum(xf * xf, axis=0, keepdims=True)[None]    # (1, 1, L)


def _normalize_kernel(a_ref, b_ref, x_ref, o_ref):
    # out = x * a + b   with a = scale*rstd, b = offset - mean*a  (single FMA)
    a = a_ref[...]                                                 # (1, L) f32
    b = b_ref[...]
    o_ref[...] = (x_ref[...].astype(jnp.float32) * a + b).astype(o_ref.dtype)


def _pick_row_tile(rows, lane):
    """Largest row-tile that divides `rows`, is a multiple of 8, and keeps the
    fp32 tile <= ~2 MiB (well under scoped VMEM with double buffering)."""
    max_elems = 512 * 1024                       # 2 MiB of fp32 per tile
    target = max(8, min(1024, max_elems // max(lane, 1)))
    if rows <= target:
        return rows                              # single full-extent tile
    for t in range(min(target, rows), 7, -1):
        if rows % t == 0 and t % 8 == 0:
            return t
    return rows                                  # fallback: one big (legal) tile


def _lane_pack(x, scale, offset):
    """Flatten x to a lane-dense 2-D [rows, L] view, tiling scale/offset to L."""
    D = x.shape[-1]
    N = x.size
    if D % 128 == 0:
        return x.reshape(-1, D), scale, offset, D
    if (128 % D == 0) and (N % 128 == 0):
        reps = 128 // D
        return x.reshape(-1, 128), jnp.tile(scale, reps), jnp.tile(offset, reps), 128
    # Fallback: natural last-dim layout (may use masked stores).
    return x.reshape(-1, D), scale, offset, D


@jax.jit
def layernorm(x, scale, offset):
    """x: [..., D], scale/offset: [D]. Global-mean/std layernorm (torch spec)."""
    orig_shape = x.shape
    n = x.size
    x2, scale_l, offset_l, L = _lane_pack(x, scale, offset)
    rows = x2.shape[0]
    tr = _pick_row_tile(rows, L)
    num_tiles = rows // tr

    # ---- Pass A: per-tile (sum, sumsq) fp32 partials (parallel grid) --------
    sums, sqs = pl.pallas_call(
        _partial_sums_kernel,
        out_shape=(
            jax.ShapeDtypeStruct((num_tiles, 1, L), jnp.float32),
            jax.ShapeDtypeStruct((num_tiles, 1, L), jnp.float32),
        ),
        grid=(num_tiles,),
        in_specs=[pl.BlockSpec((tr, L), lambda i: (i, 0))],
        out_specs=(
            pl.BlockSpec((1, 1, L), lambda i: (i, 0, 0)),
            pl.BlockSpec((1, 1, L), lambda i: (i, 0, 0)),
        ),
        compiler_params=pltpu.CompilerParams(
            dimension_semantics=("parallel",),
            vmem_limit_bytes=_VMEM_LIMIT),
    )(x2)

    # ---- Combine partials (tiny arrays; Chan-style two-level variance) ------
    col_sum = sums[:, 0, :]                  # (num_tiles, L); each column = tr elems
    col_sq = sqs[:, 0, :]
    mean = jnp.sum(col_sum) / n
    col_mean = col_sum / tr
    col_m2 = col_sq - col_sum * col_mean                       # per-column SS
    m2 = jnp.sum(col_m2) + tr * jnp.sum((col_mean - mean) ** 2)
    var = m2 / (n - 1)                                         # Bessel (torch.std)
    rstd = jax.lax.rsqrt(var)

    # Fold mean/rstd/scale/offset into one per-lane FMA: out = x * a + b.
    a_vec = (scale_l.astype(jnp.float32) * rstd).reshape(1, L)
    b_vec = offset_l.astype(jnp.float32).reshape(1, L) - mean * a_vec

    # ---- Pass B: lane-dense tiled normalize (parallel grid) -----------------
    out2 = pl.pallas_call(
        _normalize_kernel,
        out_shape=jax.ShapeDtypeStruct((rows, L), x.dtype),
        grid=(num_tiles,),
        in_specs=[
            pl.BlockSpec((1, L), lambda i: (0, 0)),
            pl.BlockSpec((1, L), lambda i: (0, 0)),
            pl.BlockSpec((tr, L), lambda i: (i, 0)),
        ],
        out_specs=pl.BlockSpec((tr, L), lambda i: (i, 0)),
        compiler_params=pltpu.CompilerParams(
            dimension_semantics=("parallel",),
            vmem_limit_bytes=_VMEM_LIMIT),
    )(a_vec, b_vec, x2)

    return out2.reshape(orig_shape)


if __name__ == "__main__":
    key = jax.random.PRNGKey(0)
    B, S, D = 2, 8, 32

    x = jax.random.normal(key, (B, S, D), dtype=jnp.float32)

    # Deterministic parameter init (matches nn.Parameter(torch.ones/zeros(dim))).
    scale = jnp.ones((D,), dtype=jnp.float32)
    offset = jnp.zeros((D,), dtype=jnp.float32)

    out = layernorm(x, scale, offset)
    out = jax.block_until_ready(out)

    # Pure-JAX reference (global mean, unbiased std) for a sanity check.
    m = jnp.mean(x)
    s = jnp.std(x, ddof=1)
    ref = (x - m) / s * scale + offset
    assert jnp.allclose(out, ref, atol=1e-5, rtol=1e-5), "mismatch vs reference"

    print("KERNEL_OK")
</pallas_src>

<mosaic_0001>
module attributes {stable_mosaic.version = 11 : i64} {
  func.func @_partial_sums_kernel(%arg0: i32, %arg1: memref<4x128xf32, #tpu.memory_space<vmem>>, %arg2: memref<1x1x128xf32, #tpu.memory_space<vmem>>, %arg3: memref<1x1x128xf32, #tpu.memory_space<vmem>>) attributes {dimension_semantics = [#tpu.dimension_semantics<parallel>], iteration_bounds = array<i64: 1>, scalar_prefetch = 0 : i64, scratch_operands = 0 : i64, tpu.core_type = #tpu.core_type<tc>, window_params = [{transform_indices = @transform_0, window_bounds = array<i64: 4, 128>}, {transform_indices = @transform_1, window_bounds = array<i64: 1, 1, 128>}, {transform_indices = @transform_2, window_bounds = array<i64: 1, 1, 128>}]} {
    %c0 = arith.constant 0 : index
    %c0_0 = arith.constant 0 : index
    %0 = vector.load %arg1[%c0, %c0_0] : memref<4x128xf32, #tpu.memory_space<vmem>>, vector<4x128xf32>
    %cst = arith.constant dense<0.000000e+00> : vector<128xf32>
    %1 = vector.multi_reduction <add>, %0, %cst [0] : vector<4x128xf32> to vector<128xf32>
    %2 = vector.shape_cast %1 : vector<128xf32> to vector<1x128xf32>
    %3 = vector.shape_cast %2 : vector<1x128xf32> to vector<1x1x128xf32>
    %c0_1 = arith.constant 0 : index
    %c0_2 = arith.constant 0 : index
    %c0_3 = arith.constant 0 : index
    %4 = vector.load %arg2[%c0_1, %c0_2, %c0_3] : memref<1x1x128xf32, #tpu.memory_space<vmem>>, vector<1x1x128xf32>
    tpu.vector_store %arg2[%c0_1, %c0_2, %c0_3], %3 {strides = array<i32>} : memref<1x1x128xf32, #tpu.memory_space<vmem>>, vector<1x1x128xf32>,
    %5 = arith.mulf %0, %0 : vector<4x128xf32>
    %cst_4 = arith.constant dense<0.000000e+00> : vector<128xf32>
    %6 = vector.multi_reduction <add>, %5, %cst_4 [0] : vector<4x128xf32> to vector<128xf32>
    %7 = vector.shape_cast %6 : vector<128xf32> to vector<1x128xf32>
    %8 = vector.shape_cast %7 : vector<1x128xf32> to vector<1x1x128xf32>
    %c0_5 = arith.constant 0 : index
    %c0_6 = arith.constant 0 : index
    %c0_7 = arith.constant 0 : index
    %9 = vector.load %arg3[%c0_5, %c0_6, %c0_7] : memref<1x1x128xf32, #tpu.memory_space<vmem>>, vector<1x1x128xf32>
    tpu.vector_store %arg3[%c0_5, %c0_6, %c0_7], %8 {strides = array<i32>} : memref<1x1x128xf32, #tpu.memory_space<vmem>>, vector<1x1x128xf32>,
    return
  }
  func.func @transform_0(%arg0: i32) -> (i32, i32) {
    %c0_i32 = arith.constant 0 : i32
    %c0_i32_0 = arith.constant 0 : i32
    return %arg0, %c0_i32 : i32, i32
  }
  func.func @transform_1(%arg0: i32) -> (i32, i32, i32) {
    %c0_i32 = arith.constant 0 : i32
    %c0_i32_0 = arith.constant 0 : i32
    %c0_i32_1 = arith.constant 0 : i32
    return %arg0, %c0_i32, %c0_i32_0 : i32, i32, i32
  }
  func.func @transform_2(%arg0: i32) -> (i32, i32, i32) {
    %c0_i32 = arith.constant 0 : i32
    %c0_i32_0 = arith.constant 0 : i32
    %c0_i32_1 = arith.constant 0 : i32
    return %arg0, %c0_i32, %c0_i32_0 : i32, i32, i32
  }
}

module attributes {stable_mosaic.version = 11 : i64} {
  func.func @_normalize_kernel(%arg0: i32, %arg1: memref<1x128xf32, #tpu.memory_space<vmem>>, %arg2: memref<1x128xf32, #tpu.memory_space<vmem>>, %arg3: memref<4x128xf32, #tpu.memory_space<vmem>>, %arg4: memref<4x128xf32, #tpu.memory_space<vmem>>) attributes {dimension_semantics = [#tpu.dimension_semantics<parallel>], iteration_bounds = array<i64: 1>, scalar_prefetch = 0 : i64, scratch_operands = 0 : i64, tpu.core_type = #tpu.core_type<tc>, window_params = [{pipeline_mode = #tpu.pipeline_mode<synchronous>, transform_indices = @transform_0, window_bounds = array<i64: 1, 128>}, {pipeline_mode = #tpu.pipeline_mode<synchronous>, transform_indices = @transform_1, window_bounds = array<i64: 1, 128>}, {transform_indices = @transform_2, window_bounds = array<i64: 4, 128>}, {transform_indices = @transform_3, window_bounds = array<i64: 4, 128>}]} {
    %c0 = arith.constant 0 : index
    %c0_0 = arith.constant 0 : index
    %0 = vector.load %arg1[%c0, %c0_0] : memref<1x128xf32, #tpu.memory_space<vmem>>, vector<1x128xf32>
    %c0_1 = arith.constant 0 : index
    %c0_2 = arith.constant 0 : index
    %1 = vector.load %arg2[%c0_1, %c0_2] : memref<1x128xf32, #tpu.memory_space<vmem>>, vector<1x128xf32>
    %c0_3 = arith.constant 0 : index
    %c0_4 = arith.constant 0 : index
    %2 = vector.load %arg3[%c0_3, %c0_4] : memref<4x128xf32, #tpu.memory_space<vmem>>, vector<4x128xf32>
    %3 = vector.broadcast %0 : vector<1x128xf32> to vector<4x128xf32>
    %4 = arith.mulf %2, %3 : vector<4x128xf32>
    %5 = vector.broadcast %1 : vector<1x128xf32> to vector<4x128xf32>
    %6 = arith.addf %4, %5 : vector<4x128xf32>
    %c0_5 = arith.constant 0 : index
    %c0_6 = arith.constant 0 : index
    %7 = vector.load %arg4[%c0_5, %c0_6] : memref<4x128xf32, #tpu.memory_space<vmem>>, vector<4x128xf32>
    tpu.vector_store %arg4[%c0_5, %c0_6], %6 {strides = array<i32>} : memref<4x128xf32, #tpu.memory_space<vmem>>, vector<4x128xf32>,
    return
  }
  func.func @transform_0(%arg0: i32) -> (i32, i32) {
    %c0_i32 = arith.constant 0 : i32
    %c0_i32_0 = arith.constant 0 : i32
    %c0_i32_1 = arith.constant 0 : i32
    return %c0_i32, %c0_i32_0 : i32, i32
  }
  func.func @transform_1(%arg0: i32) -> (i32, i32) {
    %c0_i32 = arith.constant 0 : i32
    %c0_i32_0 = arith.constant 0 : i32
    %c0_i32_1 = arith.constant 0 : i32
    return %c0_i32, %c0_i32_0 : i32, i32
  }
  func.func @transform_2(%arg0: i32) -> (i32, i32) {
    %c0_i32 = arith.constant 0 : i32
    %c0_i32_0 = arith.constant 0 : i32
    return %arg0, %c0_i32 : i32, i32
  }
  func.func @transform_3(%arg0: i32) -> (i32, i32) {
    %c0_i32 = arith.constant 0 : i32
    %c0_i32_0 = arith.constant 0 : i32
    return %arg0, %c0_i32 : i32, i32
  }
}

</mosaic_0001>

<bundles_post_ra>
// kernel: layernorm.2
= control target key start
LH: loop header
LB: loop body
LE: loop exit
PB: predicated region body
PF: predicated region fallthrough
CT: control target
= control target key end

     0   :  { %vm11_vm0 = vcmask 1043456   ;;  %s61_s0 = inlined_call_operand.vmem [shape: f32[4,128], index: 0, kind: input, shape index: {}]   ;;  %s62_s1 = inlined_call_operand.vmem [shape: f32[1,1,128], index: 1, kind: output, shape index: {0}]   ;;  %s63_s2 = inlined_call_operand.vmem [shape: f32[1,1,128], index: 2, kind: output, shape index: {1}]  }
   0x1   :  { %v10_v0 = vld [vmem:[%s61_s0] sm:$0xf] }
   0x2   :  { %v12_v1 = vsel %vm11_vm0, %v10_v0, 0.0  ;;  %v20_v2 = vmul.f32 %v10_v0, %v10_v0 }
   0x3   :  { %v13_v3 = vrot.slane %v12_v1, 4 }
   0x4   :  { %v21_v4 = vsel %vm11_vm0, %v20_v2, 0.0 }
   0x5   :  { %v14_v5 = vadd.f32 %v13_v3, %v12_v1  ;;  %v22_v6 = vrot.slane %v21_v4, 4 }
   0x7   :  { %v15_v7 = vrot.slane %v14_v5, 2  ;;  %v23_v8 = vadd.f32 %v22_v6, %v21_v4 }
   0x9   :  { %v16_v9 = vadd.f32 %v15_v7, %v14_v5  ;;  %v24_v10 = vrot.slane %v23_v8, 2 }
   0xb   :  { %v17_v11 = vrot.slane %v16_v9, 1  ;;  %v25_v12 = vadd.f32 %v24_v10, %v23_v8 }
   0xd   :  { %v18_v13 = vadd.f32 %v17_v11, %v16_v9  ;;  %v26_v14 = vrot.slane %v25_v12, 1 }
   0xf   :  { %19 = vst [vmem:[%s62_s1] sm:$0x1] %v18_v13  ;;  %v27_v15 = vadd.f32 %v26_v14, %v25_v12 }
  0x11   :  { %28 = vst [vmem:[%s63_s2] sm:$0x1] %v27_v15 }

// kernel: layernorm.3
= control target key start
LH: loop header
LB: loop body
LE: loop exit
PB: predicated region body
PF: predicated region fallthrough
CT: control target
= control target key end

     0   :  { %s70_s0 = inlined_call_operand.vmem [shape: f32[1,128], index: 0, kind: input, shape index: {}]   ;;  %s71_s1 = inlined_call_operand.vmem [shape: f32[1,128], index: 1, kind: input, shape index: {}]   ;;  %s72_s2 = inlined_call_operand.vmem [shape: f32[4,128], index: 2, kind: input, shape index: {}]   ;;  %s73_s3 = inlined_call_operand.vmem [shape: f32[4,128], index: 3, kind: output, shape index: {}]  }
   0x1   :  { %v36_v0 = vld [vmem:[%s70_s0] ss:$0 sm:$0xff] }
   0x2   :  { %v37_v1 = vld [vmem:[%s71_s1] ss:$0 sm:$0xff] }
   0x3   :  { %v16_v2 = vld [vmem:[%s72_s2] sm:$0xf] }
   0x4   :  { %v23_v3 = vmul.f32 %v36_v0, %v16_v2 }
   0x6   :  { %v30_v4 = vadd.f32 %v37_v1, %v23_v3 }
   0x8   :  { %31 = vst [vmem:[%s73_s3] sm:$0xf] %v30_v4 }

</bundles_post_ra>
